<compile_context>
chip_gen: v7x
topology: tpu7x:2x2x1
jax: 0.10.0
libtpu: 0.0.40
codegen_flags: <defaults>
</compile_context>

<pallas_src>
import functools

import jax
import jax.numpy as jnp
from jax import lax
from jax.experimental import pallas as pl
from jax.experimental.pallas import tpu as pltpu


def _triple_conv_kernel(x_ref, mask_ref, w1_ref, b1_ref, w2_ref, b2_ref,
                        w3_ref, b3_ref, o_ref, pad_ref, col_ref,
                        *, H, W, cin, nb):
    """Fused 3x(conv3x3(pad=1) + folded-BN bias + ReLU), planar layout, nb images/block.

    x_ref:    (nb, cin, H*(W+2))         input, W axis pre-padded with 2 zero columns
    mask_ref: (1, nb*H*(W+2))            1.0 on valid pixels, 0.0 on the 2 wrap columns
    wX_ref:   (coutX, 9*cin)             im2col^T weights, BN scale pre-folded
    bX_ref:   (coutX, 1)                 folded conv-bias + BN shift
    o_ref:    (nb, cout, H*(W+2))        lane-dense output (wrap columns sliced off later)
    pad_ref:  (cin, nb*(H+2)*(W+2)+2)    VMEM planar padded activations (zero halo)
    col_ref:  (9*cin, nb*H*(W+2))        VMEM im2col^T operand
    """
    Wp, Hp = W + 2, H + 2
    npix = H * Wp           # output pixels per image (incl. 2 wrap columns per row)
    ppix = Hp * Wp          # padded pixels per image

    # Zero the slab once per grid step; the halo then stays zero for all three layers
    # because every interior write-back below carries pre-masked (zeroed) wrap columns.
    pad_ref[...] = jnp.zeros_like(pad_ref)

    def write_back(y):
        # y: (c, nb*npix), wrap columns already zeroed -> interior of the padded slab.
        for b in range(nb):
            base = b * ppix + Wp + 1
            pad_ref[:, base:base + npix] = y[:, b * npix:(b + 1) * npix]

    # Load the input (its 2 padded columns are zero, so the halo stays intact).
    for b in range(nb):
        base = b * ppix + Wp + 1
        pad_ref[:, base:base + npix] = x_ref[b].astype(jnp.float32)

    def conv_bias_relu(w_ref, b_ref):
        # im2col^T: each of the 9 taps is one contiguous lane-offset slice per image.
        for dy in range(3):
            for dx in range(3):
                t = dy * 3 + dx
                for b in range(nb):
                    src = b * ppix + dy * Wp + dx
                    col_ref[t * cin:(t + 1) * cin, b * npix:(b + 1) * npix] = (
                        pad_ref[:, src:src + npix])
        # One lane-dense MXU matmul per layer: (cout_l, 9*cin) x (9*cin, nb*npix).
        acc = jnp.dot(w_ref[...], col_ref[...],
                      preferred_element_type=jnp.float32)
        return jnp.maximum(acc + b_ref[...], 0.0)        # folded bias + ReLU

    write_back(conv_bias_relu(w1_ref, b1_ref) * mask_ref[...])
    write_back(conv_bias_relu(w2_ref, b2_ref) * mask_ref[...])
    y = conv_bias_relu(w3_ref, b3_ref)                   # wrap columns sliced off outside
    for b in range(nb):
        o_ref[b] = y[:, b * npix:(b + 1) * npix].astype(o_ref.dtype)


def _triple_conv_pallas(x_slab, mask, w1, b1, w2, b2, w3, b3, *, H, W, nb):
    N, cin, npix = x_slab.shape
    num_blocks = N // nb
    cout = w3.shape[0]
    kernel = functools.partial(_triple_conv_kernel, H=H, W=W, cin=cin, nb=nb)
    full2d = lambda n: (0, 0)
    return pl.pallas_call(
        kernel,
        out_shape=jax.ShapeDtypeStruct((N, cout, npix), x_slab.dtype),
        grid=(num_blocks,),
        in_specs=[
            pl.BlockSpec((nb, cin, npix), lambda n: (n, 0, 0)),
            pl.BlockSpec(mask.shape, full2d),
            pl.BlockSpec(w1.shape, full2d),
            pl.BlockSpec(b1.shape, full2d),
            pl.BlockSpec(w2.shape, full2d),
            pl.BlockSpec(b2.shape, full2d),
            pl.BlockSpec(w3.shape, full2d),
            pl.BlockSpec(b3.shape, full2d),
        ],
        out_specs=pl.BlockSpec((nb, cout, npix), lambda n: (n, 0, 0)),
        scratch_shapes=[
            pltpu.VMEM((cin, nb * (H + 2) * (W + 2) + 2), jnp.float32),  # padded slab
            pltpu.VMEM((9 * cin, nb * npix), jnp.float32),               # im2col^T
        ],
        compiler_params=pltpu.CompilerParams(
            dimension_semantics=("parallel",)),
    )(x_slab, mask, w1, b1, w2, b2, w3, b3)


def _fold_layer(w_hwio, conv_bias, gamma, beta, running_mean, running_var, eps=1e-5):
    """Fold conv bias + eval-mode BatchNorm2d into (cout, 9*cin) weights and a bias col."""
    s = gamma / jnp.sqrt(running_var + eps)
    w = (w_hwio * s[None, None, None, :]).reshape(-1, w_hwio.shape[-1])   # (9*cin, cout)
    b = (conv_bias - running_mean) * s + beta
    return w.T.astype(jnp.float32), b.reshape(-1, 1).astype(jnp.float32)  # (cout,9cin),(cout,1)


@functools.partial(jax.jit, static_argnames=("num_batch_blocks",))
def triple_conv3x3(x_nchw, raw_params, num_batch_blocks=2):
    """PyTorch-layout entry point: NCHW in, NCHW out (no NCHW<->NHWC transposes).

    num_batch_blocks=2 -> two parallel grid blocks (feeds both v7x TensorCores).
    num_batch_blocks=1 -> whole batch in one grid step (single-TC v5e/v6e).
    """
    N, cin, H, W = x_nchw.shape
    Wp = W + 2
    (w1, b1), (w2, b2), (w3, b3) = [_fold_layer(**p) for p in raw_params]
    cout = w3.shape[0]

    num_blocks = max(1, min(num_batch_blocks, N))
    while N % num_blocks:           # ensure the batch splits evenly
        num_blocks -= 1
    nb = N // num_blocks

    # NCHW is already planar: zero-pad the W axis by 2 and flatten pixels onto lanes.
    x_slab = jnp.pad(x_nchw, ((0, 0), (0, 0), (0, 0), (0, 2))).reshape(N, cin, H * Wp)
    # 0/1 lane mask over the nb images stacked in one block (zeros on the 2 wrap columns).
    row_mask = jnp.concatenate(
        [jnp.ones((H, W), jnp.float32), jnp.zeros((H, 2), jnp.float32)], axis=1)
    mask = jnp.tile(row_mask.reshape(1, H * Wp), (1, nb))

    y_slab = _triple_conv_pallas(x_slab, mask, w1, b1, w2, b2, w3, b3, H=H, W=W, nb=nb)
    # Drop the 2 wrap columns; the result is already NCHW.
    return y_slab.reshape(N, cout, H, Wp)[:, :, :, :W]


def make_raw_params(key, in_feat, out_feat):
    """Deterministic synthetic parameters with PyTorch-equivalent shapes (eval mode)."""
    params = []
    chans = [(in_feat, in_feat), (in_feat, in_feat), (in_feat, out_feat)]
    keys = jax.random.split(key, len(chans))
    for k, (ci, co) in zip(keys, chans):
        kw, kb, kg, kbe, km, kv = jax.random.split(k, 6)
        params.append(dict(
            w_hwio=0.1 * jax.random.normal(kw, (3, 3, ci, co), jnp.float32),
            conv_bias=0.1 * jax.random.normal(kb, (co,), jnp.float32),
            gamma=1.0 + 0.05 * jax.random.normal(kg, (co,), jnp.float32),
            beta=0.05 * jax.random.normal(kbe, (co,), jnp.float32),
            running_mean=0.05 * jax.random.normal(km, (co,), jnp.float32),
            running_var=1.0 + 0.05 * jax.random.uniform(kv, (co,), jnp.float32),
        ))
    return params


def _reference(x_nchw, raw_params, eps=1e-5):
    """Pure-JAX reference: conv(+bias) -> eval BatchNorm2d -> ReLU, three times."""
    x = jnp.transpose(x_nchw, (0, 2, 3, 1))
    for p in raw_params:
        y = lax.conv_general_dilated(
            x, p["w_hwio"], window_strides=(1, 1), padding="SAME",
            dimension_numbers=("NHWC", "HWIO", "NHWC"))
        y = y + p["conv_bias"][None, None, None, :]
        y = ((y - p["running_mean"]) / jnp.sqrt(p["running_var"] + eps)
             * p["gamma"] + p["beta"])
        x = jnp.maximum(y, 0.0)
    return jnp.transpose(x, (0, 3, 1, 2))


if __name__ == "__main__":
    in_feat, out_feat, dropout = 4, 8, 0.25   # dropout unused at inference
    N, H, W = 2, 16, 16

    key = jax.random.PRNGKey(0)
    kx, kp = jax.random.split(key)
    x = jax.random.normal(kx, (N, in_feat, H, W), jnp.float32)   # NCHW, like PyTorch
    raw_params = make_raw_params(kp, in_feat, out_feat)

    ref = _reference(x, raw_params)

    # 2 blocks = two parallel grid steps (v7x dual TC); 1 block = collapsed batch (v5e/v6e).
    for blocks in (2, 1):
        out = jax.block_until_ready(
            triple_conv3x3(x, raw_params, num_batch_blocks=blocks))
        assert out.shape == (N, out_feat, H, W), out.shape
        assert jnp.allclose(out, ref, atol=1e-4, rtol=1e-4), (
            f"mismatch vs reference (num_batch_blocks={blocks})")

    print("KERNEL_OK")
</pallas_src>

<mosaic_0001>
module attributes {stable_mosaic.version = 11 : i64} {
  func.func @_triple_conv_kernel(%arg0: i32, %arg1: memref<1x4x288xf32, #tpu.memory_space<vmem>>, %arg2: memref<1x288xf32, #tpu.memory_space<vmem>>, %arg3: memref<4x36xf32, #tpu.memory_space<vmem>>, %arg4: memref<4x1xf32, #tpu.memory_space<vmem>>, %arg5: memref<4x36xf32, #tpu.memory_space<vmem>>, %arg6: memref<4x1xf32, #tpu.memory_space<vmem>>, %arg7: memref<8x36xf32, #tpu.memory_space<vmem>>, %arg8: memref<8x1xf32, #tpu.memory_space<vmem>>, %arg9: memref<1x8x288xf32, #tpu.memory_space<vmem>>, %arg10: memref<4x326xf32, #tpu.memory_space<vmem>>, %arg11: memref<36x288xf32, #tpu.memory_space<vmem>>) attributes {dimension_semantics = [#tpu.dimension_semantics<parallel>], iteration_bounds = array<i64: 2>, scalar_prefetch = 0 : i64, scratch_operands = 2 : i64, tpu.core_type = #tpu.core_type<tc>, window_params = [{transform_indices = @transform_0, window_bounds = array<i64: 1, 4, 288>}, {pipeline_mode = #tpu.pipeline_mode<synchronous>, transform_indices = @transform_1, window_bounds = array<i64: 1, 288>}, {pipeline_mode = #tpu.pipeline_mode<synchronous>, transform_indices = @transform_2, window_bounds = array<i64: 4, 36>}, {pipeline_mode = #tpu.pipeline_mode<synchronous>, transform_indices = @transform_3, window_bounds = array<i64: 4, 1>}, {pipeline_mode = #tpu.pipeline_mode<synchronous>, transform_indices = @transform_4, window_bounds = array<i64: 4, 36>}, {pipeline_mode = #tpu.pipeline_mode<synchronous>, transform_indices = @transform_5, window_bounds = array<i64: 4, 1>}, {pipeline_mode = #tpu.pipeline_mode<synchronous>, transform_indices = @transform_6, window_bounds = array<i64: 8, 36>}, {pipeline_mode = #tpu.pipeline_mode<synchronous>, transform_indices = @transform_7, window_bounds = array<i64: 8, 1>}, {transform_indices = @transform_8, window_bounds = array<i64: 1, 8, 288>}]} {
    %cst = arith.constant 0.000000e+00 : f32
    %0 = vector.broadcast %cst : f32 to vector<4x326xf32>
    %c0 = arith.constant 0 : index
    %c0_0 = arith.constant 0 : index
    %1 = vector.load %arg10[%c0, %c0_0] : memref<4x326xf32, #tpu.memory_space<vmem>>, vector<4x326xf32>
    tpu.vector_store %arg10[%c0, %c0_0], %0 {strides = array<i32>} : memref<4x326xf32, #tpu.memory_space<vmem>>, vector<4x326xf32>,
    %c0_1 = arith.constant 0 : index
    %c0_2 = arith.constant 0 : index
    %c0_3 = arith.constant 0 : index
    %2 = vector.load %arg1[%c0_1, %c0_2, %c0_3] : memref<1x4x288xf32, #tpu.memory_space<vmem>>, vector<1x4x288xf32>
    %3 = vector.shape_cast %2 : vector<1x4x288xf32> to vector<4x288xf32>
    %c0_4 = arith.constant 0 : index
    %c19 = arith.constant 19 : index
    %4 = vector.load %arg10[%c0_4, %c19] : memref<4x326xf32, #tpu.memory_space<vmem>>, vector<4x288xf32>
    tpu.vector_store %arg10[%c0_4, %c19], %3 {strides = array<i32>} : memref<4x326xf32, #tpu.memory_space<vmem>>, vector<4x288xf32>,
    %c0_5 = arith.constant 0 : index
    %c0_6 = arith.constant 0 : index
    %5 = vector.load %arg10[%c0_5, %c0_6] : memref<4x326xf32, #tpu.memory_space<vmem>>, vector<4x288xf32>
    %c0_7 = arith.constant 0 : index
    %c0_8 = arith.constant 0 : index
    %6 = vector.load %arg11[%c0_7, %c0_8] : memref<36x288xf32, #tpu.memory_space<vmem>>, vector<4x288xf32>
    tpu.vector_store %arg11[%c0_7, %c0_8], %5 {strides = array<i32>} : memref<36x288xf32, #tpu.memory_space<vmem>>, vector<4x288xf32>,
    %c0_9 = arith.constant 0 : index
    %c1 = arith.constant 1 : index
    %7 = vector.load %arg10[%c0_9, %c1] : memref<4x326xf32, #tpu.memory_space<vmem>>, vector<4x288xf32>
    %c4 = arith.constant 4 : index
    %c0_10 = arith.constant 0 : index
    %8 = vector.load %arg11[%c4, %c0_10] : memref<36x288xf32, #tpu.memory_space<vmem>>, vector<4x288xf32>
    tpu.vector_store %arg11[%c4, %c0_10], %7 {strides = array<i32>} : memref<36x288xf32, #tpu.memory_space<vmem>>, vector<4x288xf32>,
    %c0_11 = arith.constant 0 : index
    %c2 = arith.constant 2 : index
    %9 = vector.load %arg10[%c0_11, %c2] : memref<4x326xf32, #tpu.memory_space<vmem>>, vector<4x288xf32>
    %c8 = arith.constant 8 : index
    %c0_12 = arith.constant 0 : index
    %10 = vector.load %arg11[%c8, %c0_12] : memref<36x288xf32, #tpu.memory_space<vmem>>, vector<4x288xf32>
    tpu.vector_store %arg11[%c8, %c0_12], %9 {strides = array<i32>} : memref<36x288xf32, #tpu.memory_space<vmem>>, vector<4x288xf32>,
    %c0_13 = arith.constant 0 : index
    %c18 = arith.constant 18 : index
    %11 = vector.load %arg10[%c0_13, %c18] : memref<4x326xf32, #tpu.memory_space<vmem>>, vector<4x288xf32>
    %c12 = arith.constant 12 : index
    %c0_14 = arith.constant 0 : index
    %12 = vector.load %arg11[%c12, %c0_14] : memref<36x288xf32, #tpu.memory_space<vmem>>, vector<4x288xf32>
    tpu.vector_store %arg11[%c12, %c0_14], %11 {strides = array<i32>} : memref<36x288xf32, #tpu.memory_space<vmem>>, vector<4x288xf32>,
    %c0_15 = arith.constant 0 : index
    %c19_16 = arith.constant 19 : index
    %13 = vector.load %arg10[%c0_15, %c19_16] : memref<4x326xf32, #tpu.memory_space<vmem>>, vector<4x288xf32>
    %c16 = arith.constant 16 : index
    %c0_17 = arith.constant 0 : index
    %14 = vector.load %arg11[%c16, %c0_17] : memref<36x288xf32, #tpu.memory_space<vmem>>, vector<4x288xf32>
    tpu.vector_store %arg11[%c16, %c0_17], %13 {strides = array<i32>} : memref<36x288xf32, #tpu.memory_space<vmem>>, vector<4x288xf32>,
    %c0_18 = arith.constant 0 : index
    %c20 = arith.constant 20 : index
    %15 = vector.load %arg10[%c0_18, %c20] : memref<4x326xf32, #tpu.memory_space<vmem>>, vector<4x288xf32>
    %c20_19 = arith.constant 20 : index
    %c0_20 = arith.constant 0 : index
    %16 = vector.load %arg11[%c20_19, %c0_20] : memref<36x288xf32, #tpu.memory_space<vmem>>, vector<4x288xf32>
    tpu.vector_store %arg11[%c20_19, %c0_20], %15 {strides = array<i32>} : memref<36x288xf32, #tpu.memory_space<vmem>>, vector<4x288xf32>,
    %c0_21 = arith.constant 0 : index
    %c36 = arith.constant 36 : index
    %17 = vector.load %arg10[%c0_21, %c36] : memref<4x326xf32, #tpu.memory_space<vmem>>, vector<4x288xf32>
    %c24 = arith.constant 24 : index
    %c0_22 = arith.constant 0 : index
    %18 = vector.load %arg11[%c24, %c0_22] : memref<36x288xf32, #tpu.memory_space<vmem>>, vector<4x288xf32>
    tpu.vector_store %arg11[%c24, %c0_22], %17 {strides = array<i32>} : memref<36x288xf32, #tpu.memory_space<vmem>>, vector<4x288xf32>,
    %c0_23 = arith.constant 0 : index
    %c37 = arith.constant 37 : index
    %19 = vector.load %arg10[%c0_23, %c37] : memref<4x326xf32, #tpu.memory_space<vmem>>, vector<4x288xf32>
    %c28 = arith.constant 28 : index
    %c0_24 = arith.constant 0 : index
    %20 = vector.load %arg11[%c28, %c0_24] : memref<36x288xf32, #tpu.memory_space<vmem>>, vector<4x288xf32>
    tpu.vector_store %arg11[%c28, %c0_24], %19 {strides = array<i32>} : memref<36x288xf32, #tpu.memory_space<vmem>>, vector<4x288xf32>,
    %c0_25 = arith.constant 0 : index
    %c38 = arith.constant 38 : index
    %21 = vector.load %arg10[%c0_25, %c38] : memref<4x326xf32, #tpu.memory_space<vmem>>, vector<4x288xf32>
    %c32 = arith.constant 32 : index
    %c0_26 = arith.constant 0 : index
    %22 = vector.load %arg11[%c32, %c0_26] : memref<36x288xf32, #tpu.memory_space<vmem>>, vector<4x288xf32>
    tpu.vector_store %arg11[%c32, %c0_26], %21 {strides = array<i32>} : memref<36x288xf32, #tpu.memory_space<vmem>>, vector<4x288xf32>,
    %c0_27 = arith.constant 0 : index
    %c0_28 = arith.constant 0 : index
    %23 = vector.load %arg3[%c0_27, %c0_28] : memref<4x36xf32, #tpu.memory_space<vmem>>, vector<4x36xf32>
    %c0_29 = arith.constant 0 : index
    %c0_30 = arith.constant 0 : index
    %24 = vector.load %arg11[%c0_29, %c0_30] : memref<36x288xf32, #tpu.memory_space<vmem>>, vector<36x288xf32>
    %cst_31 = arith.constant dense<0.000000e+00> : vector<4x288xf32>
    %25 = tpu.matmul %23, %24, %cst_31 {dimension_numbers = #tpu.dot_dimension_numbers<[1], [0], [0], [1], [0, 0, 1, 1], [], []>} : vector<4x36xf32>, vector<36x288xf32>, vector<4x288xf32> -> vector<4x288xf32>
    %c0_32 = arith.constant 0 : index
    %c0_33 = arith.constant 0 : index
    %26 = vector.load %arg4[%c0_32, %c0_33] : memref<4x1xf32, #tpu.memory_space<vmem>>, vector<4x1xf32>
    %27 = vector.broadcast %26 : vector<4x1xf32> to vector<4x288xf32>
    %28 = arith.addf %25, %27 : vector<4x288xf32>
    %cst_34 = arith.constant 0.000000e+00 : f32
    %29 = vector.broadcast %cst_34 : f32 to vector<4x288xf32>
    %30 = arith.maximumf %28, %29 : vector<4x288xf32>
    %c0_35 = arith.constant 0 : index
    %c0_36 = arith.constant 0 : index
    %31 = vector.load %arg2[%c0_35, %c0_36] : memref<1x288xf32, #tpu.memory_space<vmem>>, vector<1x288xf32>
    %32 = vector.broadcast %31 : vector<1x288xf32> to vector<4x288xf32>
    %33 = arith.mulf %30, %32 : vector<4x288xf32>
    %c0_37 = arith.constant 0 : index
    %c19_38 = arith.constant 19 : index
    %34 = vector.load %arg10[%c0_37, %c19_38] : memref<4x326xf32, #tpu.memory_space<vmem>>, vector<4x288xf32>
    tpu.vector_store %arg10[%c0_37, %c19_38], %33 {strides = array<i32>} : memref<4x326xf32, #tpu.memory_space<vmem>>, vector<4x288xf32>,
    %c0_39 = arith.constant 0 : index
    %c0_40 = arith.constant 0 : index
    %35 = vector.load %arg10[%c0_39, %c0_40] : memref<4x326xf32, #tpu.memory_space<vmem>>, vector<4x288xf32>
    %c0_41 = arith.constant 0 : index
    %c0_42 = arith.constant 0 : index
    %36 = vector.load %arg11[%c0_41, %c0_42] : memref<36x288xf32, #tpu.memory_space<vmem>>, vector<4x288xf32>
    tpu.vector_store %arg11[%c0_41, %c0_42], %35 {strides = array<i32>} : memref<36x288xf32, #tpu.memory_space<vmem>>, vector<4x288xf32>,
    %c0_43 = arith.constant 0 : index
    %c1_44 = arith.constant 1 : index
    %37 = vector.load %arg10[%c0_43, %c1_44] : memref<4x326xf32, #tpu.memory_space<vmem>>, vector<4x288xf32>
    %c4_45 = arith.constant 4 : index
    %c0_46 = arith.constant 0 : index
    %38 = vector.load %arg11[%c4_45, %c0_46] : memref<36x288xf32, #tpu.memory_space<vmem>>, vector<4x288xf32>
    tpu.vector_store %arg11[%c4_45, %c0_46], %37 {strides = array<i32>} : memref<36x288xf32, #tpu.memory_space<vmem>>, vector<4x288xf32>,
    %c0_47 = arith.constant 0 : index
    %c2_48 = arith.constant 2 : index
    %39 = vector.load %arg10[%c0_47, %c2_48] : memref<4x326xf32, #tpu.memory_space<vmem>>, vector<4x288xf32>
    %c8_49 = arith.constant 8 : index
    %c0_50 = arith.constant 0 : index
    %40 = vector.load %arg11[%c8_49, %c0_50] : memref<36x288xf32, #tpu.memory_space<vmem>>, vector<4x288xf32>
    tpu.vector_store %arg11[%c8_49, %c0_50], %39 {strides = array<i32>} : memref<36x288xf32, #tpu.memory_space<vmem>>, vector<4x288xf32>,
    %c0_51 = arith.constant 0 : index
    %c18_52 = arith.constant 18 : index
    %41 = vector.load %arg10[%c0_51, %c18_52] : memref<4x326xf32, #tpu.memory_space<vmem>>, vector<4x288xf32>
    %c12_53 = arith.constant 12 : index
    %c0_54 = arith.constant 0 : index
    %42 = vector.load %arg11[%c12_53, %c0_54] : memref<36x288xf32, #tpu.memory_space<vmem>>, vector<4x288xf32>
    tpu.vector_store %arg11[%c12_53, %c0_54], %41 {strides = array<i32>} : memref<36x288xf32, #tpu.memory_space<vmem>>, vector<4x288xf32>,
    %c0_55 = arith.constant 0 : index
    %c19_56 = arith.constant 19 : index
    %43 = vector.load %arg10[%c0_55, %c19_56] : memref<4x326xf32, #tpu.memory_space<vmem>>, vector<4x288xf32>
    %c16_57 = arith.constant 16 : index
    %c0_58 = arith.constant 0 : index
    %44 = vector.load %arg11[%c16_57, %c0_58] : memref<36x288xf32, #tpu.memory_space<vmem>>, vector<4x288xf32>
    tpu.vector_store %arg11[%c16_57, %c0_58], %43 {strides = array<i32>} : memref<36x288xf32, #tpu.memory_space<vmem>>, vector<4x288xf32>,
    %c0_59 = arith.constant 0 : index
    %c20_60 = arith.constant 20 : index
    %45 = vector.load %arg10[%c0_59, %c20_60] : memref<4x326xf32, #tpu.memory_space<vmem>>, vector<4x288xf32>
    %c20_61 = arith.constant 20 : index
    %c0_62 = arith.constant 0 : index
    %46 = vector.load %arg11[%c20_61, %c0_62] : memref<36x288xf32, #tpu.memory_space<vmem>>, vector<4x288xf32>
    tpu.vector_store %arg11[%c20_61, %c0_62], %45 {strides = array<i32>} : memref<36x288xf32, #tpu.memory_space<vmem>>, vector<4x288xf32>,
    %c0_63 = arith.constant 0 : index
    %c36_64 = arith.constant 36 : index
    %47 = vector.load %arg10[%c0_63, %c36_64] : memref<4x326xf32, #tpu.memory_space<vmem>>, vector<4x288xf32>
    %c24_65 = arith.constant 24 : index
    %c0_66 = arith.constant 0 : index
    %48 = vector.load %arg11[%c24_65, %c0_66] : memref<36x288xf32, #tpu.memory_space<vmem>>, vector<4x288xf32>
    tpu.vector_store %arg11[%c24_65, %c0_66], %47 {strides = array<i32>} : memref<36x288xf32, #tpu.memory_space<vmem>>, vector<4x288xf32>,
    %c0_67 = arith.constant 0 : index
    %c37_68 = arith.constant 37 : index
    %49 = vector.load %arg10[%c0_67, %c37_68] : memref<4x326xf32, #tpu.memory_space<vmem>>, vector<4x288xf32>
    %c28_69 = arith.constant 28 : index
    %c0_70 = arith.constant 0 : index
    %50 = vector.load %arg11[%c28_69, %c0_70] : memref<36x288xf32, #tpu.memory_space<vmem>>, vector<4x288xf32>
    tpu.vector_store %arg11[%c28_69, %c0_70], %49 {strides = array<i32>} : memref<36x288xf32, #tpu.memory_space<vmem>>, vector<4x288xf32>,
    %c0_71 = arith.constant 0 : index
    %c38_72 = arith.constant 38 : index
    %51 = vector.load %arg10[%c0_71, %c38_72] : memref<4x326xf32, #tpu.memory_space<vmem>>, vector<4x288xf32>
    %c32_73 = arith.constant 32 : index
    %c0_74 = arith.constant 0 : index
    %52 = vector.load %arg11[%c32_73, %c0_74] : memref<36x288xf32, #tpu.memory_space<vmem>>, vector<4x288xf32>
    tpu.vector_store %arg11[%c32_73, %c0_74], %51 {strides = array<i32>} : memref<36x288xf32, #tpu.memory_space<vmem>>, vector<4x288xf32>,
    %c0_75 = arith.constant 0 : index
    %c0_76 = arith.constant 0 : index
    %53 = vector.load %arg5[%c0_75, %c0_76] : memref<4x36xf32, #tpu.memory_space<vmem>>, vector<4x36xf32>
    %c0_77 = arith.constant 0 : index
    %c0_78 = arith.constant 0 : index
    %54 = vector.load %arg11[%c0_77, %c0_78] : memref<36x288xf32, #tpu.memory_space<vmem>>, vector<36x288xf32>
    %cst_79 = arith.constant dense<0.000000e+00> : vector<4x288xf32>
    %55 = tpu.matmul %53, %54, %cst_79 {dimension_numbers = #tpu.dot_dimension_numbers<[1], [0], [0], [1], [0, 0, 1, 1], [], []>} : vector<4x36xf32>, vector<36x288xf32>, vector<4x288xf32> -> vector<4x288xf32>
    %c0_80 = arith.constant 0 : index
    %c0_81 = arith.constant 0 : index
    %56 = vector.load %arg6[%c0_80, %c0_81] : memref<4x1xf32, #tpu.memory_space<vmem>>, vector<4x1xf32>
    %57 = vector.broadcast %56 : vector<4x1xf32> to vector<4x288xf32>
    %58 = arith.addf %55, %57 : vector<4x288xf32>
    %cst_82 = arith.constant 0.000000e+00 : f32
    %59 = vector.broadcast %cst_82 : f32 to vector<4x288xf32>
    %60 = arith.maximumf %58, %59 : vector<4x288xf32>
    %c0_83 = arith.constant 0 : index
    %c0_84 = arith.constant 0 : index
    %61 = vector.load %arg2[%c0_83, %c0_84] : memref<1x288xf32, #tpu.memory_space<vmem>>, vector<1x288xf32>
    %62 = vector.broadcast %61 : vector<1x288xf32> to vector<4x288xf32>
    %63 = arith.mulf %60, %62 : vector<4x288xf32>
    %c0_85 = arith.constant 0 : index
    %c19_86 = arith.constant 19 : index
    %64 = vector.load %arg10[%c0_85, %c19_86] : memref<4x326xf32, #tpu.memory_space<vmem>>, vector<4x288xf32>
    tpu.vector_store %arg10[%c0_85, %c19_86], %63 {strides = array<i32>} : memref<4x326xf32, #tpu.memory_space<vmem>>, vector<4x288xf32>,
    %c0_87 = arith.constant 0 : index
    %c0_88 = arith.constant 0 : index
    %65 = vector.load %arg10[%c0_87, %c0_88] : memref<4x326xf32, #tpu.memory_space<vmem>>, vector<4x288xf32>
    %c0_89 = arith.constant 0 : index
    %c0_90 = arith.constant 0 : index
    %66 = vector.load %arg11[%c0_89, %c0_90] : memref<36x288xf32, #tpu.memory_space<vmem>>, vector<4x288xf32>
    tpu.vector_store %arg11[%c0_89, %c0_90], %65 {strides = array<i32>} : memref<36x288xf32, #tpu.memory_space<vmem>>, vector<4x288xf32>,
    %c0_91 = arith.constant 0 : index
    %c1_92 = arith.constant 1 : index
    %67 = vector.load %arg10[%c0_91, %c1_92] : memref<4x326xf32, #tpu.memory_space<vmem>>, vector<4x288xf32>
    %c4_93 = arith.constant 4 : index
    %c0_94 = arith.constant 0 : index
    %68 = vector.load %arg11[%c4_93, %c0_94] : memref<36x288xf32, #tpu.memory_space<vmem>>, vector<4x288xf32>
    tpu.vector_store %arg11[%c4_93, %c0_94], %67 {strides = array<i32>} : memref<36x288xf32, #tpu.memory_space<vmem>>, vector<4x288xf32>,
    %c0_95 = arith.constant 0 : index
    %c2_96 = arith.constant 2 : index
    %69 = vector.load %arg10[%c0_95, %c2_96] : memref<4x326xf32, #tpu.memory_space<vmem>>, vector<4x288xf32>
    %c8_97 = arith.constant 8 : index
    %c0_98 = arith.constant 0 : index
    %70 = vector.load %arg11[%c8_97, %c0_98] : memref<36x288xf32, #tpu.memory_space<vmem>>, vector<4x288xf32>
    tpu.vector_store %arg11[%c8_97, %c0_98], %69 {strides = array<i32>} : memref<36x288xf32, #tpu.memory_space<vmem>>, vector<4x288xf32>,
    %c0_99 = arith.constant 0 : index
    %c18_100 = arith.constant 18 : index
    %71 = vector.load %arg10[%c0_99, %c18_100] : memref<4x326xf32, #tpu.memory_space<vmem>>, vector<4x288xf32>
    %c12_101 = arith.constant 12 : index
    %c0_102 = arith.constant 0 : index
    %72 = vector.load %arg11[%c12_101, %c0_102] : memref<36x288xf32, #tpu.memory_space<vmem>>, vector<4x288xf32>
    tpu.vector_store %arg11[%c12_101, %c0_102], %71 {strides = array<i32>} : memref<36x288xf32, #tpu.memory_space<vmem>>, vector<4x288xf32>,
    %c0_103 = arith.constant 0 : index
    %c19_104 = arith.constant 19 : index
    %73 = vector.load %arg10[%c0_103, %c19_104] : memref<4x326xf32, #tpu.memory_space<vmem>>, vector<4x288xf32>
    %c16_105 = arith.constant 16 : index
    %c0_106 = arith.constant 0 : index
    %74 = vector.load %arg11[%c16_105, %c0_106] : memref<36x288xf32, #tpu.memory_space<vmem>>, vector<4x288xf32>
    tpu.vector_store %arg11[%c16_105, %c0_106], %73 {strides = array<i32>} : memref<36x288xf32, #tpu.memory_space<vmem>>, vector<4x288xf32>,
    %c0_107 = arith.constant 0 : index
    %c20_108 = arith.constant 20 : index
    %75 = vector.load %arg10[%c0_107, %c20_108] : memref<4x326xf32, #tpu.memory_space<vmem>>, vector<4x288xf32>
    %c20_109 = arith.constant 20 : index
    %c0_110 = arith.constant 0 : index
    %76 = vector.load %arg11[%c20_109, %c0_110] : memref<36x288xf32, #tpu.memory_space<vmem>>, vector<4x288xf32>
    tpu.vector_store %arg11[%c20_109, %c0_110], %75 {strides = array<i32>} : memref<36x288xf32, #tpu.memory_space<vmem>>, vector<4x288xf32>,
    %c0_111 = arith.constant 0 : index
    %c36_112 = arith.constant 36 : index
    %77 = vector.load %arg10[%c0_111, %c36_112] : memref<4x326xf32, #tpu.memory_space<vmem>>, vector<4x288xf32>
    %c24_113 = arith.constant 24 : index
    %c0_114 = arith.constant 0 : index
    %78 = vector.load %arg11[%c24_113, %c0_114] : memref<36x288xf32, #tpu.memory_space<vmem>>, vector<4x288xf32>
    tpu.vector_store %arg11[%c24_113, %c0_114], %77 {strides = array<i32>} : memref<36x288xf32, #tpu.memory_space<vmem>>, vector<4x288xf32>,
    %c0_115 = arith.constant 0 : index
    %c37_116 = arith.constant 37 : index
    %79 = vector.load %arg10[%c0_115, %c37_116] : memref<4x326xf32, #tpu.memory_space<vmem>>, vector<4x288xf32>
    %c28_117 = arith.constant 28 : index
    %c0_118 = arith.constant 0 : index
    %80 = vector.load %arg11[%c28_117, %c0_118] : memref<36x288xf32, #tpu.memory_space<vmem>>, vector<4x288xf32>
    tpu.vector_store %arg11[%c28_117, %c0_118], %79 {strides = array<i32>} : memref<36x288xf32, #tpu.memory_space<vmem>>, vector<4x288xf32>,
    %c0_119 = arith.constant 0 : index
    %c38_120 = arith.constant 38 : index
    %81 = vector.load %arg10[%c0_119, %c38_120] : memref<4x326xf32, #tpu.memory_space<vmem>>, vector<4x288xf32>
    %c32_121 = arith.constant 32 : index
    %c0_122 = arith.constant 0 : index
    %82 = vector.load %arg11[%c32_121, %c0_122] : memref<36x288xf32, #tpu.memory_space<vmem>>, vector<4x288xf32>
    tpu.vector_store %arg11[%c32_121, %c0_122], %81 {strides = array<i32>} : memref<36x288xf32, #tpu.memory_space<vmem>>, vector<4x288xf32>,
    %c0_123 = arith.constant 0 : index
    %c0_124 = arith.constant 0 : index
    %83 = vector.load %arg7[%c0_123, %c0_124] : memref<8x36xf32, #tpu.memory_space<vmem>>, vector<8x36xf32>
    %c0_125 = arith.constant 0 : index
    %c0_126 = arith.constant 0 : index
    %84 = vector.load %arg11[%c0_125, %c0_126] : memref<36x288xf32, #tpu.memory_space<vmem>>, vector<36x288xf32>
    %cst_127 = arith.constant dense<0.000000e+00> : vector<8x288xf32>
    %85 = tpu.matmul %83, %84, %cst_127 {dimension_numbers = #tpu.dot_dimension_numbers<[1], [0], [0], [1], [0, 0, 1, 1], [], []>} : vector<8x36xf32>, vector<36x288xf32>, vector<8x288xf32> -> vector<8x288xf32>
    %c0_128 = arith.constant 0 : index
    %c0_129 = arith.constant 0 : index
    %86 = vector.load %arg8[%c0_128, %c0_129] : memref<8x1xf32, #tpu.memory_space<vmem>>, vector<8x1xf32>
    %87 = vector.broadcast %86 : vector<8x1xf32> to vector<8x288xf32>
    %88 = arith.addf %85, %87 : vector<8x288xf32>
    %cst_130 = arith.constant 0.000000e+00 : f32
    %89 = vector.broadcast %cst_130 : f32 to vector<8x288xf32>
    %90 = arith.maximumf %88, %89 : vector<8x288xf32>
    %c0_131 = arith.constant 0 : index
    %c0_132 = arith.constant 0 : index
    %c0_133 = arith.constant 0 : index
    %91 = vector.load %arg9[%c0_131, %c0_132, %c0_133] : memref<1x8x288xf32, #tpu.memory_space<vmem>>, vector<1x8x288xf32>
    %92 = vector.shape_cast %91 : vector<1x8x288xf32> to vector<8x288xf32>
    %93 = vector.shape_cast %90 : vector<8x288xf32> to vector<1x8x288xf32>
    tpu.vector_store %arg9[%c0_131, %c0_132, %c0_133], %93 {strides = array<i32>} : memref<1x8x288xf32, #tpu.memory_space<vmem>>, vector<1x8x288xf32>,
    return
  }
  func.func @transform_0(%arg0: i32) -> (i32, i32, i32) {
    %c0_i32 = arith.constant 0 : i32
    %c0_i32_0 = arith.constant 0 : i32
    %c0_i32_1 = arith.constant 0 : i32
    return %arg0, %c0_i32, %c0_i32_0 : i32, i32, i32
  }
  func.func @transform_1(%arg0: i32) -> (i32, i32) {
    %c0_i32 = arith.constant 0 : i32
    %c0_i32_0 = arith.constant 0 : i32
    %c0_i32_1 = arith.constant 0 : i32
    return %c0_i32, %c0_i32_0 : i32, i32
  }
  func.func @transform_2(%arg0: i32) -> (i32, i32) {
    %c0_i32 = arith.constant 0 : i32
    %c0_i32_0 = arith.constant 0 : i32
    %c0_i32_1 = arith.constant 0 : i32
    return %c0_i32, %c0_i32_0 : i32, i32
  }
  func.func @transform_3(%arg0: i32) -> (i32, i32) {
    %c0_i32 = arith.constant 0 : i32
    %c0_i32_0 = arith.constant 0 : i32
    %c0_i32_1 = arith.constant 0 : i32
    return %c0_i32, %c0_i32_0 : i32, i32
  }
  func.func @transform_4(%arg0: i32) -> (i32, i32) {
    %c0_i32 = arith.constant 0 : i32
    %c0_i32_0 = arith.constant 0 : i32
    %c0_i32_1 = arith.constant 0 : i32
    return %c0_i32, %c0_i32_0 : i32, i32
  }
  func.func @transform_5(%arg0: i32) -> (i32, i32) {
    %c0_i32 = arith.constant 0 : i32
    %c0_i32_0 = arith.constant 0 : i32
    %c0_i32_1 = arith.constant 0 : i32
    return %c0_i32, %c0_i32_0 : i32, i32
  }
  func.func @transform_6(%arg0: i32) -> (i32, i32) {
    %c0_i32 = arith.constant 0 : i32
    %c0_i32_0 = arith.constant 0 : i32
    %c0_i32_1 = arith.constant 0 : i32
    return %c0_i32, %c0_i32_0 : i32, i32
  }
  func.func @transform_7(%arg0: i32) -> (i32, i32) {
    %c0_i32 = arith.constant 0 : i32
    %c0_i32_0 = arith.constant 0 : i32
    %c0_i32_1 = arith.constant 0 : i32
    return %c0_i32, %c0_i32_0 : i32, i32
  }
  func.func @transform_8(%arg0: i32) -> (i32, i32, i32) {
    %c0_i32 = arith.constant 0 : i32
    %c0_i32_0 = arith.constant 0 : i32
    %c0_i32_1 = arith.constant 0 : i32
    return %arg0, %c0_i32, %c0_i32_0 : i32, i32, i32
  }
}

</mosaic_0001>

<bundles_post_ra>
// kernel: triple_conv3x3.1
= control target key start
LH: loop header
LB: loop body
LE: loop exit
PB: predicated region body
PF: predicated region fallthrough
CT: control target
= control target key end

     0   :  { %s1727_s27 = smov 0   ;;  %s1996_s0 = inlined_call_operand.vmem [shape: f32[2,4,288], index: 0, kind: input, shape index: {}]   ;;  %s1997_s1 = inlined_call_operand.vmem [shape: f32[1,288], index: 1, kind: input, shape index: {}]   ;;  %s1998_s2 = inlined_call_operand.vmem [shape: f32[4,36], index: 2, kind: input, shape index: {}]   ;;  %s1999_s3 = inlined_call_operand.vmem [shape: f32[4,1], index: 3, kind: input, shape index: {}]   ;;  %s2000_s4 = inlined_call_operand.vmem [shape: f32[4,36], index: 4, kind: input, shape index: {}]   ;;  %s2001_s5 = inlined_call_operand.vmem [shape: f32[4,1], index: 5, kind: input, shape index: {}]   ;;  %s2002_s6 = inlined_call_operand.vmem [shape: f32[8,36], index: 6, kind: input, shape index: {}]   ;;  %s2003_s7 = inlined_call_operand.vmem [shape: f32[8,1], index: 7, kind: input, shape index: {}]   ;;  %s2004_s8 = inlined_call_operand.vmem [shape: f32[2,8,288], index: 8, kind: output, shape index: {}]  }
   0x1 LB: > { %s1496_s28 = sadd.s32 4294967295, %s1667_s27   ;;  %p1500_p0 = scmp.ge.s32.totalorder %s1667_s27, 1  ;;  %s1667_s27 = sphi %s1727_s27, %s18_s27  }
   0x2   : > { %p262_p1 = scmp.lt.s32.totalorder %s1667_s27, 3 }
   0x4   : > { %p263_p2 = pnand %p1500_p0, %p262_p1 }
   0x5   : > { %p296_p3 = scmp.lt.s32.totalorder (!%p263_p2), %s1496_s28, 1  ;;  %v1669_v0 = vmov (!%p263_p2), 0.0   ;;  %vm307_vm0 = vcmask (!%p263_p2), 568320   ;;  %s1670_s11 = smov (!%p263_p2), 19   ;;  %vm323_vm1 = vcmask (!%p263_p2), 1043608   ;;  %vm324_vm2 = vcmask (!%p263_p2), 1047556  }
   0x6   : > { %266 = sbr.rel (%p263_p2) target bundleno = 1571 (0x623), region = 52  ;;  %306 = vst [vmem:[#allocation2] sm:$0xff] (!%p263_p2), %v1669_v0  ;;  %603 = vmatprep.mubr.f32.mxu0 (!%p263_p2), %v1669_v0  ;;  %308 = vst.msk [vmem:[#allocation2 + $0x8] sm:$0xf] (!%p263_p2), %vm307_vm0, %v1669_v0  ;;  %vm318_vm3 = vcmask (!%p263_p2), 154624   ;;  %vm327_vm5 = vcmask (!%p263_p2), 412672  }
   0x7   : > { %vm1746_vm4 = vmor (!%p263_p2), %vm324_vm2, %vm323_vm1  ;;  %vm336_vm6 = vcmask (!%p263_p2), 257024   ;;  %s1671_s12 = smov (!%p263_p2), 110   ;;  %s1672_s13 = smov (!%p263_p2), 127   ;;  %v1678_v19 = vmov (!%p263_p2), 0.0|0.0   ;;  %v519_v22 = vld [vmem:[%s1999_s3] sm:$0xf] (!%p263_p2) }
   0x8   : > { %s1673_s14 = smov (!%p263_p2), 109   ;;  %s1674_s15 = smov (!%p263_p2), 126   ;;  %1585 = vmatprep.subr.bf16.mxu1 (!%p263_p2), %v1678_v19  ;;  %vm1680_vm7 = vmmov (!%p263_p2), 0   ;;  %v1681_v23 = vmov (!%p263_p2), 0   ;;  %vm371_vm8 = vcmask (!%p263_p2), 1031168   ;;  %vm350_vm9 = vcmask (!%p263_p2), 1039360  }
   0x9   : > { %s1675_s16 = smov (!%p263_p2), 92   ;;  %s1676_s17 = smov (!%p263_p2), 108   ;;  %1548 = vmatprep.mubr.msk.f32.mxu1 (!%p263_p2), %vm1680_vm7, %v1669_v0  ;;  %1642 = vset.pattern.permute.xlu0 (!%p263_p2), %v1681_v23  ;;  %vm392_vm10 = vcmask (!%p263_p2), 900096   ;;  %vm358_vm11 = vcmask (!%p263_p2), 261124   ;;  %vm433_vm12 = vcmask (!%p263_p2), 883712   ;;  %vm474_vm13 = vcmask (!%p263_p2), 744448  }
   0xa   : > { %s1677_s18 = smov (!%p263_p2), 91   ;;  %s1679_s19 = smov (!%p263_p2), 90   ;;  %1643 = vset.pattern.permute.xlu1 (!%p263_p2), %v1681_v23  ;;  %vm412_vm14 = vcmask (!%p263_p2), 891904   ;;  %vm453_vm15 = vcmask (!%p263_p2), 752640   ;;  %vm494_vm0 = vcmask (!%p263_p2), 736256   ;;  %vm529_vm1 = vcmask (!%p263_p2), 1043456  }
   0xb   : > { %vm525_vm2 = vcmask (!%p263_p2), 293888  }
   0xd   : > { %s2008_s28 = smov (!%p296_p3, %s1496_s28), 1 }
   0xe   : > { %s1619_s29 = smul.u32 12, %s2008_s28 }
  0x10   : > { %s300_s10 = scalar_lea.vmem %s1996_s0, %s1619_s29 }
  0x11   : > { %v309_v1 = vld [vmem:[%s300_s10] sm:$0xff]  ;;  %v310_v2 = vld [vmem:[%s300_s10 + $0x8] sm:$0xf] }
  0x12   : > { %313 = vrot.lane.b32.xlu0 %v309_v1, %s1670_s11 }
  0x16   : > { %315 = vrot.lane.b32.xlu0 %v310_v2, %s1670_s11 }
  0x84   : > { %v314_v3 = vpop.permute.xlu0 %313 }
  0x85   : > { %v317_v5 = vrot.slane %v314_v3, 4 }
  0x87   : > { %v319_v6 = vsel %vm318_vm3, %v317_v5, %v314_v3 }
  0x88   : > { %326 = vst.msk [vmem:[#allocation2] sm:$0xff] %vm1746_vm4, %v319_v6  ;;  %v316_v7 = vpop.permute.xlu0 %315 }
  0x89   : > { %v320_v8 = vsel %vm318_vm3, %v317_v5, %v316_v7 }
  0x8a   : > { %328 = vst.msk [vmem:[#allocation2 + $0x8] sm:$0xf] %vm327_vm5, %v320_v8 }
  0x8f   : > { %v329_v9 = vld [vmem:[#allocation2] sm:$0xff] }
  0x90   : > { %v332_v10 = vcombine.high %v329_v9, %v329_v9  ;;  %334 = vst [vmem:[#allocation3] sm:$0xf] %v329_v9  ;;  %388 = vrot.lane.b32.xlu0 %v329_v9, %s1671_s12  ;;  %346 = vrot.lane.b32.xlu1 %v329_v9, %s1672_s13  ;;  %v342_v15 = vcombine.low %v329_v9, %v329_v9 }
  0x91   : > { %v330_v11 = vld [vmem:[#allocation2 + $0x8] sm:$0xf] }
  0x92   : > { %335 = vst [vmem:[#allocation3 + $0x8] sm:$0xf] %v332_v10  ;;  %337 = vst.msk [vmem:[#allocation3 + $0x10] sm:$0xf] %vm336_vm6, %v330_v11  ;;  %v402_v12 = vld [vmem:[#allocation2 + $0x8] sm:$0xf] }
  0x93   : > { %v361_v13 = vld [vmem:[#allocation2 + $0x8] sm:$0xf] }
  0x94   : > { %410 = vrot.lane.b32.xlu0 %v402_v12, %s1673_s14  ;;  %369 = vrot.lane.b32.xlu1 %v361_v13, %s1674_s15  ;;  %v443_v14 = vld [vmem:[#allocation2 + $0x8] sm:$0xf] }
  0x95   : > { %v1645_v16 = vld [vmem:[#allocation2 + $0x8] ss:$0 sps:$4 sm:$0xff]  }
  0x96   : > { %v1646_v17 = vld [vmem:[#allocation2 + $0x8] ss:$0 sps:$4 sm:$0xff]  }
  0x97   : > { %v1647_v18 = vld [vmem:[#allocation2 + $0x8] ss:$0 sps:$4 sm:$0xff]  }
  0x98   : > { %451 = vrot.lane.b32.xlu0 %v443_v14, %s1675_s16  ;;  %365 = vrot.lane.b32.xlu1 %v329_v9, %s1674_s15  ;;  %v1648_v20 = vld [vmem:[#allocation2 + $0x8] ss:$0 sps:$4 sm:$0xff]   ;;  %v503_v14 = vld [vmem:[%s1998_s2] sm:$0xf] }
  0x99   : > { %v484_v21 = vld [vmem:[#allocation2 + $0x8] sm:$0xf] }
  0x9c   : > { %367 = vrot.lane.b32.xlu0 %v332_v10, %s1674_s15  ;;  %429 = vrot.lane.b32.xlu1 %v329_v9, %s1676_s17 }
  0xa0   : > { %344 = vrot.lane.b32.xlu0 %v342_v15, %s1672_s13  ;;  %470 = vrot.lane.b32.xlu1 %v329_v9, %s1677_s18 }
  0xa4   : > { %386 = vrot.lane.b32.xlu0 %v342_v15, %s1671_s12  ;;  %406 = vrot.lane.b32.xlu1 %v329_v9, %s1673_s14 }
  0xa8   : > { %431 = vrot.lane.b32.xlu0 %v1645_v16, %s1676_s17  ;;  %447 = vrot.lane.b32.xlu1 %v329_v9, %s1675_s16 }
  0xac   : > { %472 = vrot.lane.b32.xlu0 %v1646_v17, %s1677_s18  ;;  %348 = vrot.lane.b32.xlu1 %v1647_v18, %s1672_s13 }
  0xb0   : > { %427 = vrot.lane.b32.xlu0 %v342_v15, %s1676_s17  ;;  %390 = vrot.lane.b32.xlu1 %v1648_v20, %s1671_s12 }
  0xb4   : > { %468 = vrot.lane.b32.xlu0 %v342_v15, %s1677_s18  ;;  %408 = vrot.lane.b32.xlu1 %v332_v10, %s1673_s14 }
  0xb8   : > { %492 = vrot.lane.b32.xlu0 %v484_v21, %s1679_s19  ;;  %449 = vrot.lane.b32.xlu1 %v332_v10, %s1675_s16 }
  0xbc   : > { %490 = vrot.lane.b32.xlu1 %v332_v10, %s1679_s19  ;;  %522 = vperm.xlu0 %1642, %v519_v22  }
  0xc0   : > { %488 = vrot.lane.b32.xlu1 %v329_v9, %s1679_s19 }
 0x102   : > { %v347_v24 = vpop.permute.xlu1 %346  ;;  %v389_v25 = vpop.permute.xlu0 %388 }
 0x106   : > { %v370_v26 = vpop.permute.xlu1 %369  ;;  %v411_v27 = vpop.permute.xlu0 %410 }
 0x107   : > { %379 = vst.msk [vmem:[#allocation3 + $0x28] sm:$0xf] %vm336_vm6, %v370_v26  ;;  %420 = vst.msk [vmem:[#allocation3 + $0x40] sm:$0xf] %vm336_vm6, %v411_v27 }
 0x10a   : > { %v366_v28 = vpop.permute.xlu1 %365  ;;  %v452_v29 = vpop.permute.xlu0 %451 }
 0x10b   : > { %461 = vst.msk [vmem:[#allocation3 + $0x58] sm:$0xf] %vm336_vm6, %v452_v29 }
 0x10e   : > { %v430_v30 = vpop.permute.xlu1 %429  ;;  %v368_v31 = vpop.permute.xlu0 %367 }
 0x10f   : > { %v372_v32 = vsel %vm371_vm8, %v366_v28, %v368_v31  ;;  %v373_v33 = vsel %vm371_vm8, %v368_v31, %v370_v26  ;;  %v683_v31 = vld [vmem:[%s1997_s1] sm:$0x7] }
 0x110   : > { %377 = vst [vmem:[#allocation3 + $0x18] sm:$0xf] %v372_v32  ;;  %378 = vst [vmem:[#allocation3 + $0x20] sm:$0xf] %v373_v33 }
 0x112   : > { %v471_v34 = vpop.permute.xlu1 %470  ;;  %v345_v35 = vpop.permute.xlu0 %344 }
 0x113   : > { %v351_v36 = vsel %vm350_vm9, %v345_v35, %v347_v24 }
 0x114   : > { %356 = vst [vmem:[#allocation3] sm:$0xf0] %v351_v36 }
 0x116   : > { %v407_v37 = vpop.permute.xlu1 %406  ;;  %v387_v38 = vpop.permute.xlu0 %386 }
 0x117   : > { %v393_v39 = vsel %vm392_vm10, %v387_v38, %v389_v25 }
 0x118   : > { %398 = vst [vmem:[#allocation3 + $0x18] sm:$0xf0] %v393_v39 }
 0x11a   : > { %v448_v40 = vpop.permute.xlu1 %447  ;;  %v432_v41 = vpop.permute.xlu0 %431 }
 0x11b   : > { %v435_v42 = vsel %vm433_vm12, %v430_v30, %v432_v41  ;;  %441 = vst.msk [vmem:[#allocation3 + $0x40] sm:$0xf0] %vm358_vm11, %v432_v41  ;;  %v504_v5 = vld [vmem:[#allocation3] sm:$0xff] }
 0x11c   : > { %440 = vst [vmem:[#allocation3 + $0x38] sm:$0xf0] %v435_v42 }
 0x11e   : > { %v349_v43 = vpop.permute.xlu1 %348  ;;  %v473_v44 = vpop.permute.xlu0 %472 }
 0x11f   : > { %v352_v45 = vsel %vm350_vm9, %v347_v24, %v349_v43  ;;  %359 = vst.msk [vmem:[#allocation3 + $0x10] sm:$0xf0] %vm358_vm11, %v349_v43  ;;  %v476_v46 = vsel %vm474_vm13, %v471_v34, %v473_v44  ;;  %482 = vst.msk [vmem:[#allocation3 + $0x58] sm:$0xf0] %vm358_vm11, %v473_v44  ;;  %v507_v60 = vld [vmem:[#allocation3 + $0x18] sm:$0xff] }
 0x120   : > { %357 = vst [vmem:[#allocation3 + $0x8] sm:$0xf0] %v352_v45  ;;  %481 = vst [vmem:[#allocation3 + $0x50] sm:$0xf0] %v476_v46  ;;  %v1579_v7 = vpack.c.bf16 %v507_v60, %v504_v5 }
 0x122   : > { %v391_v47 = vpop.permute.xlu1 %390  ;;  %v428_v48 = vpop.permute.xlu0 %427  ;;  %v512_v9 = vld [vmem:[#allocation3 + $0x40] sm:$0xff] }
 0x123   : > { %v394_v49 = vsel %vm392_vm10, %v389_v25, %v391_v47  ;;  %400 = vst.msk [vmem:[#allocation3 + $0x28] sm:$0xf0] %vm358_vm11, %v391_v47  ;;  %v434_v50 = vsel %vm433_vm12, %v428_v48, %v430_v30  ;;  %v685_v25 = vlaneseq }
 0x124   : > { %399 = vst [vmem:[#allocation3 + $0x20] sm:$0xf0] %v394_v49  ;;  %439 = vst [vmem:[#allocation3 + $0x30] sm:$0xf0] %v434_v50 }
 0x125   : > { %v1824_v26 = vshrl.u32 %v685_v25, 7 }
 0x126   : > { %v409_v51 = vpop.permute.xlu1 %408  ;;  %v469_v52 = vpop.permute.xlu0 %468  ;;  %v506_v58 = vld [vmem:[#allocation3 + $0x10] sm:$0xff]  ;;  %v515_v6 = vld [vmem:[#allocation3 + $0x58] sm:$0xff] }
 0x127   : > { %v413_v53 = vsel %vm412_vm14, %v407_v37, %v409_v51  ;;  %v414_v54 = vsel %vm412_vm14, %v409_v51, %v411_v27  ;;  %v475_v55 = vsel %vm474_vm13, %v469_v52, %v471_v34  ;;  %v505_v1 = vld [vmem:[#allocation3 + $0x8] sm:$0xff]  ;;  %v1589_v11 = vpack.c.bf16 %v515_v6, %v512_v9 }
 0x128   : > { %418 = vst [vmem:[#allocation3 + $0x30] sm:$0xf] %v413_v53  ;;  %419 = vst [vmem:[#allocation3 + $0x38] sm:$0xf] %v414_v54  ;;  %v691_v32 = vsub.s32 1, %v1824_v26  ;;  %v695_v42 = vsub.s32 2, %v1824_v26 }
 0x129   : > { %480 = vst [vmem:[#allocation3 + $0x48] sm:$0xf0] %v475_v55 }
 0x12a   : > { %v450_v56 = vpop.permute.xlu1 %449  ;;  %v493_v57 = vpop.permute.xlu0 %492  ;;  %v509_v59 = vld [vmem:[#allocation3 + $0x28] sm:$0xff]  ;;  %v692_v38 = vrot.slane %v683_v31, %v691_v32  ;;  %v696_v46 = vrot.slane %v683_v31, %v695_v42 }
 0x12b   : > { %v454_v61 = vsel %vm453_vm15, %v448_v40, %v450_v56  ;;  %v455_v62 = vsel %vm453_vm15, %v450_v56, %v452_v29  ;;  %502 = vst.msk [vmem:[#allocation3 + $0x70] sm:$0xf] %vm336_vm6, %v493_v57  ;;  %v1586_v63 = vpack.c.bf16 %v509_v59, %v506_v58  ;;  %v508_v2 = vld [vmem:[#allocation3 + $0x20] sm:$0xff]  ;;  %v687_v29 = vsub.s32 0, %v1824_v26 }
 0x12c   : > { %459 = vst [vmem:[#allocation3 + $0x48] sm:$0xf] %v454_v61  ;;  %460 = vst [vmem:[#allocation3 + $0x50] sm:$0xf] %v455_v62  ;;  %v1577_v3 = vpack.c.bf16 %v508_v2, %v505_v1 }
 0x12d   : > { %1587 = vmatpush3.bf16.msra.mxu1 %v1586_v63  ;;  %v688_v36 = vrot.slane %v683_v31, %v687_v29 }
 0x12e   : > { %v491_v8 = vpop.permute.xlu1 %490  ;;  %1578 = vmatprep.subr.bf16.mxu0 %v1577_v3  ;;  %1588 = vmatprep.subr.bf16.mxu1 %v1678_v19  ;;  %v898_v3 = vld [vmem:[%s2001_s5] sm:$0xf] }
 0x12f   : > { %v496_v10 = vsel %vm494_vm0, %v491_v8, %v493_v57  ;;  %1580 = vmatpush1.bf16.msra.mxu0 %v1579_v7  ;;  %v511_v13 = vld [vmem:[#allocation3 + $0x38] sm:$0xff]  ;;  %v510_v17 = vld [vmem:[#allocation3 + $0x30] sm:$0xff] }
 0x130   : > { %501 = vst [vmem:[#allocation3 + $0x68] sm:$0xf] %v496_v10 }
 0x131   : > { %1590 = vmatpush3.bf16.msra.mxu1 %v1589_v11 }
 0x132   : > { %v489_v12 = vpop.permute.xlu1 %488  ;;  %1546 = vmatprep.subr.mxu1 %v1669_v0  ;;  %v518_v20 = vld [vmem:[#allocation3 + $0x70] sm:$0xf] }
 0x133   : > { %v495_v15 = vsel %vm494_vm0, %v489_v12, %v491_v8  ;;  %v514_v16 = vld [vmem:[#allocation3 + $0x50] sm:$0xff]  ;;  %v513_v18 = vld [vmem:[#allocation3 + $0x48] sm:$0xff] }
 0x134   : > { %500 = vst [vmem:[#allocation3 + $0x60] sm:$0xf] %v495_v15  ;;  %v1581_v21 = vpack.c.bf16 %v514_v16, %v511_v13  ;;  %v1583_v22 = vpack.c.bf16 %v513_v18, %v510_v17 }
 0x135   : > { %1547 = vmatpush3.msk.msra.mxu1 %vm529_vm1, %v518_v20 }
 0x136   : > { %1582 = vmatprep.subr.bf16.mxu0 %v1581_v21  ;;  %1549 = vmatmul.mubr.msk.f32.vlgmr.msra.gmra.mrb[0].mxu1 %vm525_vm2, %v503_v14 }
 0x137   : > { %1584 = vmatpush1.bf16.msra.mxu0 %v1583_v22  ;;  %v517_v23 = vld [vmem:[#allocation3 + $0x68] sm:$0xf]  ;;  %1599 = vmatprep.subr.bf16.mxu1 %v1678_v19 }
 0x138   : > { %1503 = vmatprep.subr.msk.mxu0 %vm529_vm1, %v517_v23  ;;  %1561 = vmatprep.mubr.msk.f32.mxu1 %vm1680_vm7, %v1669_v0 }
 0x13b   : > { %v516_v24 = vld [vmem:[#allocation3 + $0x60] sm:$0xf]  ;;  %v523_v30 = vpop.permute.xlu0 %522 }
 0x13c   : > { %1504 = vmatpush1.msk.msra.mxu0 %vm529_vm1, %v516_v24 }
 0x13d   : > { %1505 = vmatmul.mubr.msk.f32.vlgmr.msra.gmra.mrb[0].mxu0 %vm525_vm2, %v503_v14 }
 0x13e   : > { %980 = vmatprep.mubr.f32.mxu0 %v1669_v0 }
 0x209   : > { %v676_v27 = vpop.f32.mrb[0].mxu1 }
 0x20a   : > { %v1550_v28 = vpop.f32.mrb[1].mxu1  ;;  %v677_v41 = vadd.f32 %v676_v27, %v523_v30 }
 0x20c   : > { %v682_v45 = vmax.f32 %v677_v41, 0.0 }
 0x20e   : > { %v702_v48 = vmul.f32 %v696_v46, %v682_v45 }
 0x210   : > { %v605_v33 = vpop.f32.mrb[0].mxu0 }
 0x211   : > { %v606_v34 = vadd.f32 %v605_v33, %v523_v30  ;;  %v607_v35 = vpop.f32.mrb[1].mxu0 }
 0x212   : > { %v608_v37 = vadd.f32 %v607_v35, %v523_v30 }
 0x213   : > { %v680_v39 = vmax.f32 %v606_v34, 0.0 }
 0x214   : > { %v681_v40 = vmax.f32 %v608_v37, 0.0 }
 0x215   : > { %v700_v43 = vmul.f32 %v688_v36, %v680_v39 }
 0x216   : > { %v701_v44 = vmul.f32 %v692_v38, %v681_v40 }
 0x218   : > { %v706_v47 = vcombine.low %v700_v43, %v701_v44 }
 0x21a   : > { %707 = vrot.lane.b32.xlu1 %v706_v47, %s1670_s11 }
 0x21e   : > { %709 = vrot.lane.b32.xlu1 %v702_v48, %s1670_s11 }
 0x28c   : > { %v708_v49 = vpop.permute.xlu1 %707 }
 0x28d   : > { %v711_v50 = vrot.slane %v708_v49, 4 }
 0x28f   : > { %v712_v51 = vsel %vm318_vm3, %v711_v50, %v708_v49 }
 0x290   : > { %716 = vst.msk [vmem:[#allocation2] sm:$0xff] %vm1746_vm4, %v712_v51  ;;  %v710_v52 = vpop.permute.xlu1 %709 }
 0x291   : > { %v713_v53 = vsel %vm318_vm3, %v711_v50, %v710_v52 }
 0x292   : > { %717 = vst.msk [vmem:[#allocation2 + $0x8] sm:$0xf] %vm327_vm5, %v713_v53 }
 0x297   : > { %v726_v54 = vld [vmem:[#allocation2] sm:$0xff] }
 0x298   : > { %734 = vrot.lane.b32.xlu0 %v726_v54, %s1672_s13  ;;  %v750_v55 = vcombine.high %v726_v54, %v726_v54  ;;  %723 = vst [vmem:[#allocation3] sm:$0xf] %v726_v54  ;;  %v730_v60 = vcombine.low %v726_v54, %v726_v54 }
 0x299   : > { %v747_v56 = vld [vmem:[#allocation2 + $0x8] sm:$0xf] }
 0x29a   : > { %755 = vrot.lane.b32.xlu1 %v747_v56, %s1674_s15  ;;  %724 = vst [vmem:[#allocation3 + $0x8] sm:$0xf] %v750_v55  ;;  %v719_v57 = vld [vmem:[#allocation2 + $0x8] sm:$0xf] }
 0x29b   : > { %725 = vst.msk [vmem:[#allocation3 + $0x10] sm:$0xf] %vm336_vm6, %v719_v57  ;;  %v786_v58 = vld [vmem:[#allocation2 + $0x8] sm:$0xf] }
 0x29c   : > { %773 = vrot.lane.b32.xlu0 %v726_v54, %s1671_s12  ;;  %v825_v59 = vld [vmem:[#allocation2 + $0x8] sm:$0xf] }
 0x29d   : > { %v1651_v61 = vld [vmem:[#allocation2 + $0x8] ss:$0 sps:$4 sm:$0xff]  }
 0x29e   : > { %751 = vrot.lane.b32.xlu1 %v726_v54, %s1674_s15  ;;  %v1652_v62 = vld [vmem:[#allocation2 + $0x8] ss:$0 sps:$4 sm:$0xff]  }
 0x29f   : > { %v1653_v63 = vld [vmem:[#allocation2 + $0x8] ss:$0 sps:$4 sm:$0xff]  }
 0x2a0   : > { %794 = vrot.lane.b32.xlu0 %v786_v58, %s1673_s14  ;;  %v1654_v1 = vld [vmem:[#allocation2 + $0x8] ss:$0 sps:$4 sm:$0xff]  }
 0x2a1   : > { %v864_v2 = vld [vmem:[#allocation2 + $0x8] sm:$0xf] }
 0x2a2   : > { %812 = vrot.lane.b32.xlu1 %v726_v54, %s1676_s17 }
 0x2a4   : > { %833 = vrot.lane.b32.xlu0 %v825_v59, %s1675_s16 }
 0x2a6   : > { %851 = vrot.lane.b32.xlu1 %v726_v54, %s1677_s18 }
 0x2a8   : > { %753 = vrot.lane.b32.xlu0 %v750_v55, %s1674_s15 }
 0x2aa   : > { %790 = vrot.lane.b32.xlu1 %v726_v54, %s1673_s14 }
 0x2ac   : > { %732 = vrot.lane.b32.xlu0 %v730_v60, %s1672_s13 }
 0x2ae   : > { %829 = vrot.lane.b32.xlu1 %v726_v54, %s1675_s16 }
 0x2b0   : > { %771 = vrot.lane.b32.xlu0 %v730_v60, %s1671_s12 }
 0x2b2   : > { %736 = vrot.lane.b32.xlu1 %v1651_v61, %s1672_s13 }
 0x2b4   : > { %814 = vrot.lane.b32.xlu0 %v1652_v62, %s1676_s17 }
 0x2b6   : > { %775 = vrot.lane.b32.xlu1 %v1653_v63, %s1671_s12 }
 0x2b8   : > { %853 = vrot.lane.b32.xlu0 %v1654_v1, %s1677_s18 }
 0x2ba   : > { %792 = vrot.lane.b32.xlu1 %v750_v55, %s1673_s14 }
 0x2bc   : > { %810 = vrot.lane.b32.xlu0 %v730_v60, %s1676_s17 }
 0x2be   : > { %831 = vrot.lane.b32.xlu1 %v750_v55, %s1675_s16 }
 0x2c0   : > { %849 = vrot.lane.b32.xlu0 %v730_v60, %s1677_s18 }
 0x2c2   : > { %870 = vrot.lane.b32.xlu1 %v750_v55, %s1679_s19 }
 0x2c4   : > { %872 = vrot.lane.b32.xlu0 %v864_v2, %s1679_s19 }
 0x2c6   : > { %868 = vrot.lane.b32.xlu1 %v726_v54, %s1679_s19 }
 0x2c8   : > { %901 = vperm.xlu0 %1642, %v898_v3  }
 0x30a   : > { %v735_v5 = vpop.permute.xlu0 %734 }
 0x30c   : > { %v756_v6 = vpop.permute.xlu1 %755 }
 0x30d   : > { %764 = vst.msk [vmem:[#allocation3 + $0x28] sm:$0xf] %vm336_vm6, %v756_v6 }
 0x30e   : > { %v774_v7 = vpop.permute.xlu0 %773 }
 0x310   : > { %v752_v8 = vpop.permute.xlu1 %751 }
 0x312   : > { %v795_v9 = vpop.permute.xlu0 %794 }
 0x313   : > { %803 = vst.msk [vmem:[#allocation3 + $0x40] sm:$0xf] %vm336_vm6, %v795_v9 }
 0x314   : > { %v813_v10 = vpop.permute.xlu1 %812 }
 0x316   : > { %v834_v11 = vpop.permute.xlu0 %833 }
 0x317   : > { %842 = vst.msk [vmem:[#allocation3 + $0x58] sm:$0xf] %vm336_vm6, %v834_v11 }
 0x318   : > { %v852_v12 = vpop.permute.xlu1 %851 }
 0x31a   : > { %v754_v13 = vpop.permute.xlu0 %753 }
 0x31b   : > { %v757_v14 = vsel %vm371_vm8, %v752_v8, %v754_v13  ;;  %v758_v15 = vsel %vm371_vm8, %v754_v13, %v756_v6  ;;  %v882_v6 = vld [vmem:[%s2000_s4] sm:$0xf] }
 0x31c   : > { %762 = vst [vmem:[#allocation3 + $0x18] sm:$0xf] %v757_v14  ;;  %763 = vst [vmem:[#allocation3 + $0x20] sm:$0xf] %v758_v15  ;;  %v791_v16 = vpop.permute.xlu1 %790 }
 0x31e   : > { %v733_v17 = vpop.permute.xlu0 %732 }
 0x31f   : > { %v738_v18 = vsel %vm350_vm9, %v733_v17, %v735_v5 }
 0x320   : > { %743 = vst [vmem:[#allocation3] sm:$0xf0] %v738_v18  ;;  %v830_v20 = vpop.permute.xlu1 %829 }
 0x322   : > { %v772_v21 = vpop.permute.xlu0 %771 }
 0x323   : > { %v777_v22 = vsel %vm392_vm10, %v772_v21, %v774_v7 }
 0x324   : > { %782 = vst [vmem:[#allocation3 + $0x18] sm:$0xf0] %v777_v22  ;;  %v737_v23 = vpop.permute.xlu1 %736 }
 0x325   : > { %v739_v24 = vsel %vm350_vm9, %v735_v5, %v737_v23  ;;  %745 = vst.msk [vmem:[#allocation3 + $0x10] sm:$0xf0] %vm358_vm11, %v737_v23 }
 0x326   : > { %744 = vst [vmem:[#allocation3 + $0x8] sm:$0xf0] %v739_v24  ;;  %v815_v25 = vpop.permute.xlu0 %814 }
 0x327   : > { %v817_v27 = vsel %vm433_vm12, %v813_v10, %v815_v25  ;;  %823 = vst.msk [vmem:[#allocation3 + $0x40] sm:$0xf0] %vm358_vm11, %v815_v25  ;;  %v883_v51 = vld [vmem:[#allocation3] sm:$0xff] }
 0x328   : > { %822 = vst [vmem:[#allocation3 + $0x38] sm:$0xf0] %v817_v27  ;;  %v776_v28 = vpop.permute.xlu1 %775 }
 0x329   : > { %v778_v30 = vsel %vm392_vm10, %v774_v7, %v776_v28  ;;  %784 = vst.msk [vmem:[#allocation3 + $0x28] sm:$0xf0] %vm358_vm11, %v776_v28 }
 0x32a   : > { %783 = vst [vmem:[#allocation3 + $0x20] sm:$0xf0] %v778_v30  ;;  %v854_v31 = vpop.permute.xlu0 %853 }
 0x32b   : > { %v856_v33 = vsel %vm474_vm13, %v852_v12, %v854_v31  ;;  %862 = vst.msk [vmem:[#allocation3 + $0x58] sm:$0xf0] %vm358_vm11, %v854_v31  ;;  %v886_v43 = vld [vmem:[#allocation3 + $0x18] sm:$0xff] }
 0x32c   : > { %861 = vst [vmem:[#allocation3 + $0x50] sm:$0xf0] %v856_v33  ;;  %v793_v34 = vpop.permute.xlu1 %792  ;;  %v885_v40 = vld [vmem:[#allocation3 + $0x10] sm:$0xff]  ;;  %v1593_v54 = vpack.c.bf16 %v886_v43, %v883_v51 }
 0x32d   : > { %v796_v35 = vsel %vm412_vm14, %v791_v16, %v793_v34  ;;  %v797_v36 = vsel %vm412_vm14, %v793_v34, %v795_v9  ;;  %v884_v47 = vld [vmem:[#allocation3 + $0x8] sm:$0xff] }
 0x32e   : > { %801 = vst [vmem:[#allocation3 + $0x30] sm:$0xf] %v796_v35  ;;  %802 = vst [vmem:[#allocation3 + $0x38] sm:$0xf] %v797_v36  ;;  %v811_v37 = vpop.permute.xlu0 %810  ;;  %v891_v56 = vld [vmem:[#allocation3 + $0x40] sm:$0xff] }
 0x32f   : > { %v816_v38 = vsel %vm433_vm12, %v811_v37, %v813_v10  ;;  %v1060_v10 = vld [vmem:[%s1997_s1] sm:$0x7] }
 0x330   : > { %821 = vst [vmem:[#allocation3 + $0x30] sm:$0xf0] %v816_v38  ;;  %v832_v39 = vpop.permute.xlu1 %831  ;;  %v888_v41 = vld [vmem:[#allocation3 + $0x28] sm:$0xff]  ;;  %v1073_v14 = vrot.slane %v1060_v10, %v695_v42  ;;  %v1069_v24 = vrot.slane %v1060_v10, %v691_v32 }
 0x331   : > { %v835_v44 = vsel %vm453_vm15, %v830_v20, %v832_v39  ;;  %v836_v45 = vsel %vm453_vm15, %v832_v39, %v834_v11  ;;  %v1600_v46 = vpack.c.bf16 %v888_v41, %v885_v40  ;;  %v887_v48 = vld [vmem:[#allocation3 + $0x20] sm:$0xff]  ;;  %v1065_v20 = vrot.slane %v1060_v10, %v687_v29 }
 0x332   : > { %840 = vst [vmem:[#allocation3 + $0x48] sm:$0xf] %v835_v44  ;;  %841 = vst [vmem:[#allocation3 + $0x50] sm:$0xf] %v836_v45  ;;  %v850_v49 = vpop.permute.xlu0 %849  ;;  %v1591_v50 = vpack.c.bf16 %v887_v48, %v884_v47  ;;  %v894_v52 = vld [vmem:[#allocation3 + $0x58] sm:$0xff] }
 0x333   : > { %v855_v53 = vsel %vm474_vm13, %v850_v49, %v852_v12  ;;  %1601 = vmatpush3.bf16.msra.mxu1 %v1600_v46  ;;  %v1603_v57 = vpack.c.bf16 %v894_v52, %v891_v56  ;;  %v1275_v46 = vld [vmem:[%s2003_s7] sm:$0xff] }
 0x334   : > { %860 = vst [vmem:[#allocation3 + $0x48] sm:$0xf0] %v855_v53  ;;  %1592 = vmatprep.subr.bf16.mxu0 %v1591_v50  ;;  %v871_v55 = vpop.permute.xlu1 %870  ;;  %1602 = vmatprep.subr.bf16.mxu1 %v1678_v19 }
 0x335   : > { %1594 = vmatpush1.bf16.msra.mxu0 %v1593_v54  ;;  %v890_v62 = vld [vmem:[#allocation3 + $0x38] sm:$0xff] }
 0x336   : > { %v873_v58 = vpop.permute.xlu0 %872 }
 0x337   : > { %v875_v59 = vsel %vm494_vm0, %v871_v55, %v873_v58  ;;  %881 = vst.msk [vmem:[#allocation3 + $0x70] sm:$0xf] %vm336_vm6, %v873_v58  ;;  %1604 = vmatpush3.bf16.msra.mxu1 %v1603_v57  ;;  %v889_v2 = vld [vmem:[#allocation3 + $0x30] sm:$0xff] }
 0x338   : > { %880 = vst [vmem:[#allocation3 + $0x68] sm:$0xf] %v875_v59  ;;  %v869_v60 = vpop.permute.xlu1 %868  ;;  %1559 = vmatprep.subr.mxu1 %v1669_v0 }
 0x339   : > { %v874_v61 = vsel %vm494_vm0, %v869_v60, %v871_v55  ;;  %v893_v63 = vld [vmem:[#allocation3 + $0x50] sm:$0xff] }
 0x33a   : > { %879 = vst [vmem:[#allocation3 + $0x60] sm:$0xf] %v874_v61  ;;  %v1595_v1 = vpack.c.bf16 %v893_v63, %v890_v62 }
 0x33b   : > { %v892_v3 = vld [vmem:[#allocation3 + $0x48] sm:$0xff] }
 0x33c   : > { %1596 = vmatprep.subr.bf16.mxu0 %v1595_v1  ;;  %v1597_v5 = vpack.c.bf16 %v892_v3, %v889_v2 }
 0x33e   : > { %1598 = vmatpush1.bf16.msra.mxu0 %v1597_v5  ;;  %v897_v7 = vld [vmem:[#allocation3 + $0x70] sm:$0xf] }
 0x33f   : > { %1560 = vmatpush3.msk.msra.mxu1 %vm529_vm1, %v897_v7  ;;  %v896_v8 = vld [vmem:[#allocation3 + $0x68] sm:$0xf] }
 0x340   : > { %1508 = vmatprep.subr.msk.mxu0 %vm529_vm1, %v896_v8  ;;  %1562 = vmatmul.mubr.msk.f32.vlgmr.msra.gmra.mrb[2].mxu1 %vm525_vm2, %v882_v6 }
 0x341   : > { %v895_v9 = vld [vmem:[#allocation3 + $0x60] sm:$0xf]  ;;  %1613 = vmatprep.subr.bf16.mxu1 %v1678_v19  ;;  %1574 = vmatprep.mubr.msk.f32.mxu1 %vm1680_vm7, %v1669_v0 }
 0x342   : > { %1509 = vmatpush1.msk.msra.mxu0 %vm529_vm1, %v895_v9 }
 0x343   : > { %1510 = vmatmul.mubr.msk.f32.vlgmr.msra.gmra.mrb[2].mxu0 %vm525_vm2, %v882_v6 }
 0x344   : > { %1357 = vmatprep.mubr.f32.mxu0 %v1669_v0 }
 0x347   : > { %v902_v11 = vpop.permute.xlu0 %901 }
 0x413   : > { %v1053_v12 = vpop.f32.mrb[2].mxu1 }
 0x414   : > { %v1054_v13 = vadd.f32 %v1053_v12, %v902_v11  ;;  %v1563_v15 = vpop.f32.mrb[3].mxu1 }
 0x416   : > { %v1059_v16 = vmax.f32 %v1054_v13, 0.0  ;;  %v982_v17 = vpop.f32.mrb[2].mxu0 }
 0x417   : > { %v983_v18 = vadd.f32 %v982_v17, %v902_v11  ;;  %v984_v21 = vpop.f32.mrb[3].mxu0 }
 0x418   : > { %v1079_v22 = vmul.f32 %v1073_v14, %v1059_v16  ;;  %v985_v23 = vadd.f32 %v984_v21, %v902_v11 }
 0x419   : > { %v1057_v25 = vmax.f32 %v983_v18, 0.0 }
 0x41a   : > { %v1058_v27 = vmax.f32 %v985_v23, 0.0  ;;  %1086 = vrot.lane.b32.xlu0 %v1079_v22, %s1670_s11 }
 0x41b   : > { %v1077_v28 = vmul.f32 %v1065_v20, %v1057_v25 }
 0x41c   : > { %v1078_v30 = vmul.f32 %v1069_v24, %v1058_v27 }
 0x41e   : > { %v1083_v42 = vcombine.low %v1077_v28, %v1078_v30 }
 0x420   : > { %1084 = vrot.lane.b32.xlu1 %v1083_v42, %s1670_s11 }
 0x48c   : > { %v1087_v34 = vpop.permute.xlu0 %1086 }
 0x492   : > { %v1085_v31 = vpop.permute.xlu1 %1084 }
 0x493   : > { %v1088_v33 = vrot.slane %v1085_v31, 4 }
 0x495   : > { %v1089_v29 = vsel %vm318_vm3, %v1088_v33, %v1085_v31  ;;  %v1090_v35 = vsel %vm318_vm3, %v1088_v33, %v1087_v34  ;;  %vm1439_vm3 = vcmask 261120  }
 0x496   : > { %1093 = vst.msk [vmem:[#allocation2] sm:$0xff] %vm1746_vm4, %v1089_v29 }
 0x497   : > { %1094 = vst.msk [vmem:[#allocation2 + $0x8] sm:$0xf] %vm327_vm5, %v1090_v35 }
 0x49d   : > { %v1103_v26 = vld [vmem:[#allocation2] sm:$0xff] }
 0x49e   : > { %v1124_v32 = vld [vmem:[#allocation2 + $0x8] sm:$0xf]  ;;  %1111 = vrot.lane.b32.xlu1 %v1103_v26, %s1672_s13  ;;  %v1127_v36 = vcombine.high %v1103_v26, %v1103_v26  ;;  %1100 = vst [vmem:[#allocation3] sm:$0xf] %v1103_v26  ;;  %v1107_v39 = vcombine.low %v1103_v26, %v1103_v26 }
 0x49f   : > { %1132 = vrot.lane.b32.xlu0 %v1124_v32, %s1674_s15  ;;  %v1096_v37 = vld [vmem:[#allocation2 + $0x8] sm:$0xf] }
 0x4a0   : > { %1101 = vst [vmem:[#allocation3 + $0x8] sm:$0xf] %v1127_v36  ;;  %1102 = vst.msk [vmem:[#allocation3 + $0x10] sm:$0xf] %vm336_vm6, %v1096_v37  ;;  %v1163_v4 = vld [vmem:[#allocation2 + $0x8] sm:$0xf] }
 0x4a1   : > { %v1202_v38 = vld [vmem:[#allocation2 + $0x8] sm:$0xf] }
 0x4a2   : > { %1150 = vrot.lane.b32.xlu1 %v1103_v26, %s1671_s12  ;;  %v1657_v40 = vld [vmem:[#allocation2 + $0x8] ss:$0 sps:$4 sm:$0xff]  }
 0x4a3   : > { %1128 = vrot.lane.b32.xlu0 %v1103_v26, %s1674_s15  ;;  %v1658_v41 = vld [vmem:[#allocation2 + $0x8] ss:$0 sps:$4 sm:$0xff]  }
 0x4a4   : > { %v1659_v43 = vld [vmem:[#allocation2 + $0x8] ss:$0 sps:$4 sm:$0xff]  }
 0x4a5   : > { %v1660_v44 = vld [vmem:[#allocation2 + $0x8] ss:$0 sps:$4 sm:$0xff]  }
 0x4a6   : > { %1171 = vrot.lane.b32.xlu1 %v1163_v4, %s1673_s14  ;;  %v1241_v45 = vld [vmem:[#allocation2 + $0x8] sm:$0xf] }
 0x4a7   : > { %1189 = vrot.lane.b32.xlu0 %v1103_v26, %s1676_s17 }
 0x4aa   : > { %1210 = vrot.lane.b32.xlu1 %v1202_v38, %s1675_s16 }
 0x4ab   : > { %1228 = vrot.lane.b32.xlu0 %v1103_v26, %s1677_s18 }
 0x4ae   : > { %1130 = vrot.lane.b32.xlu1 %v1127_v36, %s1674_s15  ;;  %s1620_s15 = smul.u32 24, %s2008_s28 }
 0x4af   : > { %1167 = vrot.lane.b32.xlu0 %v1103_v26, %s1673_s14 }
 0x4b2   : > { %1109 = vrot.lane.b32.xlu1 %v1107_v39, %s1672_s13 }
 0x4b3   : > { %1206 = vrot.lane.b32.xlu0 %v1103_v26, %s1675_s16 }
 0x4b6   : > { %1148 = vrot.lane.b32.xlu1 %v1107_v39, %s1671_s12 }
 0x4b7   : > { %1113 = vrot.lane.b32.xlu0 %v1657_v40, %s1672_s13 }
 0x4ba   : > { %1191 = vrot.lane.b32.xlu1 %v1658_v41, %s1676_s17 }
 0x4bb   : > { %1152 = vrot.lane.b32.xlu0 %v1659_v43, %s1671_s12 }
 0x4be   : > { %1230 = vrot.lane.b32.xlu1 %v1660_v44, %s1677_s18 }
 0x4bf   : > { %1169 = vrot.lane.b32.xlu0 %v1127_v36, %s1673_s14 }
 0x4c2   : > { %1187 = vrot.lane.b32.xlu1 %v1107_v39, %s1676_s17 }
 0x4c3   : > { %1208 = vrot.lane.b32.xlu0 %v1127_v36, %s1675_s16 }
 0x4c6   : > { %1226 = vrot.lane.b32.xlu1 %v1107_v39, %s1677_s18  ;;  %s305_s18 = scalar_lea.vmem %s2004_s8, %s1620_s15 }
 0x4c7   : > { %1247 = vrot.lane.b32.xlu0 %v1127_v36, %s1679_s19 }
 0x4ca   : > { %1249 = vrot.lane.b32.xlu1 %v1241_v45, %s1679_s19 }
 0x4cb   : > { %1245 = vrot.lane.b32.xlu0 %v1103_v26, %s1679_s19 }
 0x4ce   : > { %1278 = vperm.xlu1 %1643, %v1275_v46  }
 0x510   : > { %v1112_v47 = vpop.permute.xlu1 %1111 }
 0x511   : > { %v1133_v48 = vpop.permute.xlu0 %1132 }
 0x512   : > { %1141 = vst.msk [vmem:[#allocation3 + $0x28] sm:$0xf] %vm336_vm6, %v1133_v48 }
 0x514   : > { %v1151_v49 = vpop.permute.xlu1 %1150 }
 0x515   : > { %v1129_v50 = vpop.permute.xlu0 %1128 }
 0x518   : > { %v1172_v51 = vpop.permute.xlu1 %1171 }
 0x519   : > { %v1190_v52 = vpop.permute.xlu0 %1189  ;;  %1180 = vst.msk [vmem:[#allocation3 + $0x40] sm:$0xf] %vm336_vm6, %v1172_v51 }
 0x51c   : > { %v1211_v53 = vpop.permute.xlu1 %1210 }
 0x51d   : > { %v1229_v54 = vpop.permute.xlu0 %1228  ;;  %1219 = vst.msk [vmem:[#allocation3 + $0x58] sm:$0xf] %vm336_vm6, %v1211_v53 }
 0x520   : > { %v1131_v55 = vpop.permute.xlu1 %1130 }
 0x521   : > { %v1168_v56 = vpop.permute.xlu0 %1167  ;;  %v1134_v57 = vsel %vm371_vm8, %v1129_v50, %v1131_v55  ;;  %v1135_v58 = vsel %vm371_vm8, %v1131_v55, %v1133_v48 }
 0x522   : > { %1139 = vst [vmem:[#allocation3 + $0x18] sm:$0xf] %v1134_v57  ;;  %1140 = vst [vmem:[#allocation3 + $0x20] sm:$0xf] %v1135_v58 }
 0x524   : > { %v1110_v59 = vpop.permute.xlu1 %1109 }
 0x525   : > { %v1207_v60 = vpop.permute.xlu0 %1206  ;;  %v1115_v61 = vsel %vm350_vm9, %v1110_v59, %v1112_v47 }
 0x526   : > { %1120 = vst [vmem:[#allocation3] sm:$0xf0] %v1115_v61 }
 0x528   : > { %v1149_v62 = vpop.permute.xlu1 %1148 }
 0x529   : > { %v1114_v63 = vpop.permute.xlu0 %1113  ;;  %v1154_v1 = vsel %vm392_vm10, %v1149_v62, %v1151_v49 }
 0x52a   : > { %v1116_v2 = vsel %vm350_vm9, %v1112_v47, %v1114_v63  ;;  %1122 = vst.msk [vmem:[#allocation3 + $0x10] sm:$0xf0] %vm358_vm11, %v1114_v63  ;;  %1159 = vst [vmem:[#allocation3 + $0x18] sm:$0xf0] %v1154_v1 }
 0x52b   : > { %1121 = vst [vmem:[#allocation3 + $0x8] sm:$0xf0] %v1116_v2 }
 0x52c   : > { %v1192_v3 = vpop.permute.xlu1 %1191 }
 0x52d   : > { %v1153_v5 = vpop.permute.xlu0 %1152  ;;  %v1194_v6 = vsel %vm433_vm12, %v1190_v52, %v1192_v3  ;;  %1200 = vst.msk [vmem:[#allocation3 + $0x40] sm:$0xf0] %vm358_vm11, %v1192_v3  ;;  %v1260_v27 = vld [vmem:[#allocation3] sm:$0xff] }
 0x52e   : > { %v1155_v7 = vsel %vm392_vm10, %v1151_v49, %v1153_v5  ;;  %1161 = vst.msk [vmem:[#allocation3 + $0x28] sm:$0xf0] %vm358_vm11, %v1153_v5  ;;  %1199 = vst [vmem:[#allocation3 + $0x38] sm:$0xf0] %v1194_v6 }
 0x52f   : > { %1160 = vst [vmem:[#allocation3 + $0x20] sm:$0xf0] %v1155_v7 }
 0x530   : > { %v1231_v8 = vpop.permute.xlu1 %1230 }
 0x531   : > { %v1170_v9 = vpop.permute.xlu0 %1169  ;;  %v1233_v10 = vsel %vm474_vm13, %v1229_v54, %v1231_v8  ;;  %1239 = vst.msk [vmem:[#allocation3 + $0x58] sm:$0xf0] %vm358_vm11, %v1231_v8  ;;  %v1262_v15 = vld [vmem:[#allocation3 + $0x10] sm:$0xff]  ;;  %v1263_v17 = vld [vmem:[#allocation3 + $0x18] sm:$0xff] }
 0x532   : > { %v1173_v11 = vsel %vm412_vm14, %v1168_v56, %v1170_v9  ;;  %v1174_v12 = vsel %vm412_vm14, %v1170_v9, %v1172_v51  ;;  %1238 = vst [vmem:[#allocation3 + $0x50] sm:$0xf0] %v1233_v10  ;;  %v1261_v23 = vld [vmem:[#allocation3 + $0x8] sm:$0xff]  ;;  %v1607_v28 = vpack.c.bf16 %v1263_v17, %v1260_v27 }
 0x533   : > { %1178 = vst [vmem:[#allocation3 + $0x30] sm:$0xf] %v1173_v11  ;;  %1179 = vst [vmem:[#allocation3 + $0x38] sm:$0xf] %v1174_v12 }
 0x534   : > { %v1188_v13 = vpop.permute.xlu1 %1187  ;;  %v1268_v31 = vld [vmem:[#allocation3 + $0x40] sm:$0xff] }
 0x535   : > { %v1209_v14 = vpop.permute.xlu0 %1208  ;;  %v1265_v16 = vld [vmem:[#allocation3 + $0x28] sm:$0xff]  ;;  %v1193_v18 = vsel %vm433_vm12, %v1188_v13, %v1190_v52 }
 0x536   : > { %v1212_v20 = vsel %vm453_vm15, %v1207_v60, %v1209_v14  ;;  %v1213_v21 = vsel %vm453_vm15, %v1209_v14, %v1211_v53  ;;  %v1614_v22 = vpack.c.bf16 %v1265_v16, %v1262_v15  ;;  %v1264_v24 = vld [vmem:[#allocation3 + $0x20] sm:$0xff]  ;;  %1198 = vst [vmem:[#allocation3 + $0x30] sm:$0xf0] %v1193_v18 }
 0x537   : > { %1217 = vst [vmem:[#allocation3 + $0x48] sm:$0xf] %v1212_v20  ;;  %1218 = vst [vmem:[#allocation3 + $0x50] sm:$0xf] %v1213_v21  ;;  %v1605_v25 = vpack.c.bf16 %v1264_v24, %v1261_v23 }
 0x538   : > { %1615 = vmatpush3.bf16.msra.mxu1 %v1614_v22  ;;  %v1227_v30 = vpop.permute.xlu1 %1226  ;;  %v1271_v33 = vld [vmem:[#allocation3 + $0x58] sm:$0xff] }
 0x539   : > { %1606 = vmatprep.subr.bf16.mxu0 %v1605_v25  ;;  %v1248_v42 = vpop.permute.xlu0 %1247  ;;  %1616 = vmatprep.subr.bf16.mxu1 %v1678_v19  ;;  %v1232_v34 = vsel %vm474_vm13, %v1227_v30, %v1229_v54  ;;  %v1617_v29 = vpack.c.bf16 %v1271_v33, %v1268_v31 }
 0x53a   : > { %1608 = vmatpush1.bf16.msra.mxu0 %v1607_v28  ;;  %1237 = vst [vmem:[#allocation3 + $0x48] sm:$0xf0] %v1232_v34  ;;  %v1267_v37 = vld [vmem:[#allocation3 + $0x38] sm:$0xff] }
 0x53c   : > { %1618 = vmatpush3.bf16.msra.mxu1 %v1617_v29  ;;  %v1250_v35 = vpop.permute.xlu1 %1249 }
 0x53d   : > { %v1246_v26 = vpop.permute.xlu0 %1245  ;;  %1572 = vmatprep.subr.mxu1 %v1669_v0  ;;  %v1252_v32 = vsel %vm494_vm0, %v1248_v42, %v1250_v35  ;;  %1258 = vst.msk [vmem:[#allocation3 + $0x70] sm:$0xf] %vm336_vm6, %v1250_v35  ;;  %v1266_v38 = vld [vmem:[#allocation3 + $0x30] sm:$0xff] }
 0x53e   : > { %v1251_v36 = vsel %vm494_vm0, %v1246_v26, %v1248_v42  ;;  %v1270_v19 = vld [vmem:[#allocation3 + $0x50] sm:$0xff]  ;;  %1257 = vst [vmem:[#allocation3 + $0x68] sm:$0xf] %v1252_v32 }
 0x53f   : > { %1256 = vst [vmem:[#allocation3 + $0x60] sm:$0xf] %v1251_v36  ;;  %v1609_v4 = vpack.c.bf16 %v1270_v19, %v1267_v37  ;;  %v1259_v0 = vld [vmem:[%s2002_s6] sm:$0xff] }
 0x541   : > { %1610 = vmatprep.subr.bf16.mxu0 %v1609_v4  ;;  %v1269_v39 = vld [vmem:[#allocation3 + $0x48] sm:$0xff] }
 0x542   : > { %v1611_v40 = vpack.c.bf16 %v1269_v39, %v1266_v38 }
 0x544   : > { %1612 = vmatpush1.bf16.msra.mxu0 %v1611_v40  ;;  %v1274_v41 = vld [vmem:[#allocation3 + $0x70] sm:$0xf] }
 0x545   : > { %1573 = vmatpush3.msk.msra.mxu1 %vm529_vm1, %v1274_v41  ;;  %v1273_v43 = vld [vmem:[#allocation3 + $0x68] sm:$0xf] }
 0x546   : > { %1513 = vmatprep.subr.msk.mxu0 %vm529_vm1, %v1273_v43  ;;  %1575 = vmatmul.mubr.msk.f32.vlgmr.msra.gmra.mrb[4].mxu1 %vm525_vm2, %v1259_v0  ;;  %v1272_v44 = vld [vmem:[#allocation3 + $0x60] sm:$0xf] }
 0x548   : > { %1514 = vmatpush1.msk.msra.mxu0 %vm529_vm1, %v1272_v44 }
 0x549   : > { %1515 = vmatmul.mubr.msk.f32.vlgmr.msra.gmra.mrb[4].mxu0 %vm525_vm2, %v1259_v0 }
 0x54d   : > { %v1279_v45 = vpop.permute.xlu1 %1278 }
 0x619   : > { %v1430_v46 = vpop.f32.mrb[4].mxu1 }
 0x61a   : > { %v1431_v47 = vadd.f32 %v1430_v46, %v1279_v45  ;;  %v1576_v48 = vpop.f32.mrb[5].mxu1 }
 0x61c   : > { %v1359_v49 = vpop.f32.mrb[4].mxu0  ;;  %v1436_v50 = vmax.f32 %v1431_v47, 0.0 }
 0x61d   : > { %v1360_v51 = vadd.f32 %v1359_v49, %v1279_v45  ;;  %v1361_v52 = vpop.f32.mrb[5].mxu0 }
 0x61e   : > { %1440 = vst.msk [vmem:[%s305_s18 + $0x10] sm:$0xff] %vm1439_vm3, %v1436_v50  ;;  %v1362_v53 = vadd.f32 %v1361_v52, %v1279_v45 }
 0x61f   : > { %v1434_v54 = vmax.f32 %v1360_v51, 0.0 }
 0x620   : > { %v1435_v55 = vmax.f32 %v1362_v53, 0.0 }
 0x621   : > { %1437 = vst [vmem:[%s305_s18] sm:$0xff] %v1434_v54 }
 0x622   : > { %1438 = vst [vmem:[%s305_s18 + $0x8] sm:$0xff] %v1435_v55 }
 0x623 PF: > { %s18_s27 = sadd.s32 1, %s1667_s27  }
 0x624   : > { %p15_p4 = scmp.ge.s32.totalorder %s18_s27, 4  }
 0x626   :  { %17 = sbr.rel (!%p15_p4) target bundleno = 1 (0x1), region = 82 }

</bundles_post_ra>
